<compile_context>
chip_gen: v7x
topology: tpu7x:2x2x1
jax: 0.10.0
libtpu: 0.0.40
codegen_flags: <defaults>
</compile_context>

<pallas_src>
import functools

import jax
import jax.numpy as jnp
from jax.experimental import pallas as pl
from jax.experimental.pallas import tpu as pltpu


def weighted_sum_kernel(p_ref, x_ref, o_ref):
    # p_ref: (M, 1) f32 softmaxed weights (normalized in the wrapper),
    # x_ref: (M, TN) tile of box_vols, o_ref: (1, TN) tile of the output.
    # Elementwise mul (VPU, lane-broadcast of the weight column) + sublane
    # reduce (XLU); f32 accumulation regardless of input dtype.
    acc = jnp.sum(p_ref[...] * x_ref[...], axis=0, keepdims=True)
    o_ref[...] = acc.astype(o_ref.dtype)


@functools.partial(jax.jit, static_argnames=("block_bytes", "min_pallas_n"))
def weighted_sum(
    weights: jax.Array,
    box_vols: jax.Array,
    *,
    block_bytes: int = 4 * 1024 * 1024,  # per-step box_vols bytes (input block)
    min_pallas_n: int = 0,               # N <= this -> plain XLA (no custom call)
) -> jax.Array:
    """weights: (M,), box_vols: (M, N) -> (N,)"""
    M, N = box_vols.shape
    assert weights.shape == (M,)

    # Softmax hoisted out of the kernel (runs once, not per tile). Kept in f32.
    p = jax.nn.softmax(weights.astype(jnp.float32), axis=0)

    if N <= min_pallas_n:
        # Small-N bypass: fixed Pallas launch / pipeline cost can never be
        # amortized; let XLA fuse the tiny matvec.
        out = (p[None, :] @ box_vols.astype(jnp.float32)).reshape(-1)
        return out.astype(box_vols.dtype)

    p_col = p.reshape(M, 1)  # (M, 1) f32 column, broadcast along lanes in-kernel

    itemsize = jnp.dtype(box_vols.dtype).itemsize
    n_pad128 = pl.cdiv(N, 128) * 128

    # Tile from a byte budget: budget_bytes // (M * itemsize), rounded to 128.
    budget_tile = max(128, ((block_bytes // (M * itemsize)) // 128) * 128)
    # v7x has 2 TensorCores: give the "parallel" grid axis >= 2 steps when N allows.
    min_steps = 2 if n_pad128 >= 256 else 1
    steps = max(min_steps, pl.cdiv(n_pad128, budget_tile))
    tile = pl.cdiv(pl.cdiv(n_pad128, steps), 128) * 128
    grid_n = pl.cdiv(N, tile)  # ragged N -> partial last block, masked on store

    cost = pl.CostEstimate(
        flops=2 * M * N,
        transcendentals=0,
        bytes_accessed=M * N * itemsize + N * itemsize + M * 4,
    )

    out = pl.pallas_call(
        weighted_sum_kernel,
        out_shape=jax.ShapeDtypeStruct((1, N), box_vols.dtype),
        grid_spec=pltpu.PrefetchScalarGridSpec(
            num_scalar_prefetch=0,
            grid=(grid_n,),
            in_specs=[
                pl.BlockSpec((M, 1), lambda i: (0, 0)),      # weight column (resident)
                pl.BlockSpec((M, tile), lambda i: (0, i)),   # tile of box_vols along N
            ],
            out_specs=pl.BlockSpec((1, tile), lambda i: (0, i)),
        ),
        compiler_params=pltpu.CompilerParams(
            dimension_semantics=("parallel",)),
        cost_estimate=cost,
    )(p_col, box_vols)

    # mimic torch .squeeze(): drop the size-1 leading dim
    return out[0]


def weighted_sum_ref(weights: jax.Array, box_vols: jax.Array) -> jax.Array:
    p = jax.nn.softmax(weights.astype(jnp.float32), axis=0)
    return (p[None, :] @ box_vols.astype(jnp.float32)).reshape(-1).astype(box_vols.dtype)


if __name__ == "__main__":
    key = jax.random.PRNGKey(0)
    kw, kx = jax.random.split(key)

    num_models = 8
    n_items = 256

    # Parameter init: torch.rand(num_models) -> uniform [0, 1)
    weights = jax.random.uniform(kw, (num_models,), dtype=jnp.float32)
    box_vols = jax.random.uniform(kx, (num_models, n_items), dtype=jnp.float32)

    # Pallas path (2 grid steps of 128 lanes at this size).
    out = jax.block_until_ready(weighted_sum(weights, box_vols))
    ref = weighted_sum_ref(weights, box_vols)
    assert out.shape == (n_items,)
    assert jnp.allclose(out, ref, atol=1e-5, rtol=1e-5), "mismatch vs reference"

    # Ragged-N path: no wrapper padding, partial last block masked on store.
    n_ragged = 200
    box_vols_r = jax.random.uniform(kx, (num_models, n_ragged), dtype=jnp.float32)
    out_r = jax.block_until_ready(weighted_sum(weights, box_vols_r))
    ref_r = weighted_sum_ref(weights, box_vols_r)
    assert out_r.shape == (n_ragged,)
    assert jnp.allclose(out_r, ref_r, atol=1e-5, rtol=1e-5), "mismatch vs reference (ragged N)"

    # Small-N XLA bypass path (dispatch threshold).
    out_s = jax.block_until_ready(weighted_sum(weights, box_vols, min_pallas_n=1024))
    assert jnp.allclose(out_s, ref, atol=1e-5, rtol=1e-5), "mismatch vs reference (XLA bypass)"

    print("KERNEL_OK")
</pallas_src>

<mosaic_0001>
module attributes {stable_mosaic.version = 11 : i64} {
  func.func @weighted_sum_kernel(%arg0: i32, %arg1: memref<8x1xf32, #tpu.memory_space<vmem>>, %arg2: memref<8x128xf32, #tpu.memory_space<vmem>>, %arg3: memref<1x128xf32, #tpu.memory_space<vmem>>) attributes {dimension_semantics = [#tpu.dimension_semantics<parallel>], iteration_bounds = array<i64: 2>, scalar_prefetch = 0 : i64, scratch_operands = 0 : i64, tpu.core_type = #tpu.core_type<tc>, window_params = [{pipeline_mode = #tpu.pipeline_mode<synchronous>, transform_indices = @transform_0, window_bounds = array<i64: 8, 1>}, {transform_indices = @transform_1, window_bounds = array<i64: 8, 128>}, {transform_indices = @transform_2, window_bounds = array<i64: 1, 128>}]} {
    %c0 = arith.constant 0 : index
    %c0_0 = arith.constant 0 : index
    %0 = vector.load %arg1[%c0, %c0_0] : memref<8x1xf32, #tpu.memory_space<vmem>>, vector<8x1xf32>
    %c0_1 = arith.constant 0 : index
    %c0_2 = arith.constant 0 : index
    %1 = vector.load %arg2[%c0_1, %c0_2] : memref<8x128xf32, #tpu.memory_space<vmem>>, vector<8x128xf32>
    %2 = vector.broadcast %0 : vector<8x1xf32> to vector<8x128xf32>
    %3 = arith.mulf %2, %1 : vector<8x128xf32>
    %cst = arith.constant dense<0.000000e+00> : vector<128xf32>
    %4 = vector.multi_reduction <add>, %3, %cst [0] : vector<8x128xf32> to vector<128xf32>
    %5 = vector.shape_cast %4 : vector<128xf32> to vector<1x128xf32>
    %c0_3 = arith.constant 0 : index
    %c0_4 = arith.constant 0 : index
    %6 = vector.load %arg3[%c0_3, %c0_4] : memref<1x128xf32, #tpu.memory_space<vmem>>, vector<1x128xf32>
    tpu.vector_store %arg3[%c0_3, %c0_4], %5 {strides = array<i32>} : memref<1x128xf32, #tpu.memory_space<vmem>>, vector<1x128xf32>,
    return
  }
  func.func @transform_0(%arg0: i32) -> (i32, i32) {
    %c0_i32 = arith.constant 0 : i32
    %c0_i32_0 = arith.constant 0 : i32
    %c0_i32_1 = arith.constant 0 : i32
    return %c0_i32, %c0_i32_0 : i32, i32
  }
  func.func @transform_1(%arg0: i32) -> (i32, i32) {
    %c0_i32 = arith.constant 0 : i32
    %c0_i32_0 = arith.constant 0 : i32
    return %c0_i32, %arg0 : i32, i32
  }
  func.func @transform_2(%arg0: i32) -> (i32, i32) {
    %c0_i32 = arith.constant 0 : i32
    %c0_i32_0 = arith.constant 0 : i32
    return %c0_i32, %arg0 : i32, i32
  }
}

</mosaic_0001>

<bundles_post_ra>
// kernel: weighted_sum.1
= control target key start
LH: loop header
LB: loop body
LE: loop exit
PB: predicated region body
PF: predicated region fallthrough
CT: control target
= control target key end

     0   :  { %7 = vsyncpa [#allocation3], 0  ;;  %s454_s0 = inlined_call_operand.vmem [shape: f32[8,1], index: 0, kind: input, shape index: {}]   ;;  %s455_s1 = inlined_call_operand.vmem [shape: f32[8,256], index: 1, kind: input, shape index: {}]   ;;  %s456_s2 = inlined_call_operand.hbm [shape: f32[1,256], index: 2, kind: output, shape index: {}]  }
   0x1   :  { %9 = vsyncpa [#allocation3 + $0x1], 0  ;;  %s351_s9 = smov 0   ;;  %s353_s10 = smov 0  }
   0x2   :  { %s355_s11 = smov 0   ;;  %s357_s12 = smov 0  }
   0x3 LB: > { %s372_s13 = sadd.s32 4294967295, %s332_s12   ;;  %s221_s14 = sadd.s32 4294967294, %s332_s12   ;;  %s332_s12 = sphi %s357_s12, %s462_s12   ;;  %s328_s11 = sphi %s355_s11, %s461_s11   ;;  %s324_s10 = sphi %s353_s10, %s460_s10   ;;  %s320_s9 = sphi %s351_s9, %s459_s9  }
   0x4   : > { %s376_s15 = sadd.s32 1, %s332_s12   ;;  %s69_s16 = sadd.s32 1, %s328_s11 }
   0x5   : > { %s66_s17 = ssub.s32 %s332_s12, %s376_s15  ;;  %p79_p0 = scmp.ne.s32.totalorder %s328_s11, %s324_s10 }
   0x6   : > { %p67_p1 = scmp.eq.s32.totalorder %s66_s17, 0  ;;  %p80_p2 = scmp.eq.s32.totalorder %s372_s13, 1 }
   0x7   : > { %p85_p3 = scmp.ne.s32.totalorder %s324_s10, %s320_s9  ;;  %p86_p4 = scmp.eq.s32.totalorder %s221_s14, 1 }
   0x8   : > { %s387_s18 = scalar_select %p67_p1, %s328_s11, %s69_s16  }
   0x9   : > { %p389_p5 = por %p80_p2, %p79_p0  ;;  %p393_p6 = por %p86_p4, %p85_p3 }
   0xa   : > { %p224_p7 = scmp.ge.s32.totalorder %s332_s12, 1  ;;  %p114_p8 = scmp.lt.s32.totalorder %s332_s12, 3 }
   0xc   : > { %p115_p9 = pnand %p224_p7, %p114_p8 }
   0xd   : > { %v138_v0 = vld [vmem:[%s454_s0] sm:$0xff] (!%p115_p9)  ;;  %v334_v1 = vmov (!%p115_p9), 0   ;;  %p134_p10 = scmp.lt.s32.totalorder (!%p115_p9), %s372_s13, 1  ;;  %s132_s28 = sand.u32 (!%p115_p9), 1, %s324_s10  }
   0xe   : > { %118 = sbr.rel (%p115_p9) target bundleno = 171 (0xab), region = 28  ;;  %269 = vset.pattern.permute.xlu0 (!%p115_p9), %v334_v1  ;;  %s226_s29 = sshll.u32 (!%p115_p9), %s372_s13, 4 }
   0xf   : > { %142 = vperm.xlu0 (!%p115_p9), %269, %v138_v0   ;;  %s133_s30 = scalar_lea.vmem (!%p115_p9), [#allocation2], %s132_s28  ;;  %s412_s6 = scalar_lea.hbm (!%p115_p9), %s456_s2, %s226_s29 }
  0x10   : > { %s166_s3 = sshll.u32 (!%p115_p9), %s133_s30, 4  ;;  %s154_s7 = scalar_lea.sflag (!%p115_p9), [#allocation3], %s132_s28  ;;  %s414_s3 = int_to_ptr.vmem [resolvable:$true] %s166_s3 }
  0x11   : > { %s270_s8 = scalar_lea.vmem (!%p115_p9), %s414_s3, 16 }
  0x12   : > { %p271_p11 = scmp.ne.s32.totalorder (!%p115_p9), %s414_s3, %s270_s8 }
  0x14   : > { %p272_p12 = pnand (!%p115_p9), %p271_p11, %p389_p5 }
  0x15   : > { %s135_s23 = scalar_select %p134_p10, %s372_s13, 1 }
  0x16   : > { %p273_p13 = pneg %p272_p12  ;;  %s335_s13 = smov [#allocation2]  }
  0x17   : > { %s225_s24 = sshll.u32 %s135_s23, 3  ;;  %s274_s14 = sshll.u32 %s335_s13, 4  ;;  %s275_s14 = int_to_ptr.vmem [resolvable:$false] %s274_s14 }
  0x18   : > { %s137_s27 = scalar_lea.vmem %s455_s1, %s225_s24  ;;  %s276_s16 = scalar_lea.vmem %s275_s14, 32 }
  0x19   : > { %v139_v2 = vld [vmem:[%s137_s27] sm:$0xff]  ;;  %p277_p0 = scmp.lt.s32.totalorder %s414_s3, %s275_s14  ;;  %p278_p1 = scmp.lt.s32.totalorder %s276_s16, %s270_s8 }
  0x1b   : > { %p279_p2 = por %p278_p1, %p277_p0 }
  0x1d   : > { %p280_p3 = pnand %p279_p2, %p273_p13 }
  0x8e   : > { %v143_v3 = vpop.permute.xlu0 %142 }
  0x8f   : > { %v145_v4 = vmul.f32 %v143_v3, %v139_v2 }
  0x91   : > { %v146_v5 = vrot.slane %v145_v4, 4 }
  0x93   : > { %v147_v6 = vadd.f32 %v146_v5, %v145_v4 }
  0x95   : > { %v148_v7 = vrot.slane %v147_v6, 2 }
  0x97   : > { %v149_v8 = vadd.f32 %v148_v7, %v147_v6 }
  0x99   : > { %v150_v9 = vrot.slane %v149_v8, 1 }
  0x9b   : > { %v151_v10 = vadd.f32 %v150_v9, %v149_v8 }
  0x9d   : > { %152 = vst [vmem:[%s133_s30] sm:$0x1] %v151_v10 }
  0x9e   : > { %283 = shalt.err (!%p280_p3)
}
  0x9f   : > { %s284_s17 = scalar_lea.hbm %s412_s6, 16  ;;  %s288_s23 = scalar_lea.hbm %s456_s2, 32 }
  0xa0   : > { %p285_p4 = scmp.ne.s32.totalorder %s412_s6, %s284_s17  ;;  %p289_p9 = scmp.lt.u32.totalorder %s412_s6, %s456_s2 }
  0xa1   : > { %p290_p10 = scmp.lt.u32.totalorder %s288_s23, %s284_s17  ;;  %p292_p12 = scmp.lt.u32.totalorder %s284_s17, %s412_s6 }
  0xa2   : > { %p286_p7 = pnand %p285_p4, %p389_p5 }
  0xa3   : > { %p291_p11 = por %p290_p10, %p289_p9 }
  0xa4   : > { %p287_p8 = pneg %p286_p7 }
  0xa5   : > { %p293_p13 = por %p292_p12, %p291_p11 }
  0xa7   : > { %p294_p0 = pnand %p293_p13, %p287_p8 }
  0xa9   : > { %297 = shalt.err (!%p294_p0)
}
  0xaa   : > { %229 = dma.vmem_to_hbm [thread:$0]  (%p389_p5), %s414_s3, 16, %s412_s6, %s154_s7  }
  0xab PF: > { %p235_p1 = scmp.ge.s32.totalorder %s332_s12, 2  ;;  %s178_s26 = sand.u32 1, %s320_s9  }
  0xac   : > { %s179_s27 = scalar_lea.sflag [#allocation3], %s178_s26 }
  0xad   : > { %p232_p2 = pnand %p235_p1, %p393_p6 }
  0xaf   : > { %315 = dma.done.wait (!%p232_p2), %s179_s27, 16  }
  0xb0   : > { %317 = vsyncadd (!%p232_p2), %s179_s27, 4294967280  ;;  %p12_p3 = scmp.ge.s32.totalorder %s376_s15, 4   ;;  %s459_s9 = smov %s324_s10 }
  0xb1   : > { %s460_s10 = smov %s328_s11  ;;  %s461_s11 = smov %s387_s18 }
  0xb2   : > { %s462_s12 = smov %s376_s15  ;;  %14 = sbr.rel (!%p12_p3) target bundleno = 3 (0x3), region = 63 }
  0xb9   :  { %183 = vsyncpa [#allocation3], 1 }
  0xba   :  { %185 = vsyncpa [#allocation3 + $0x1], 1 }

</bundles_post_ra>
